<compile_context>
chip_gen: v6e
topology: v6e:2x2x1
jax: 0.10.0
libtpu: 0.0.40
codegen_flags: <defaults>
</compile_context>

<pallas_src>
import functools

import jax
import jax.numpy as jnp
from jax.experimental import pallas as pl
from jax.experimental.pallas import tpu as pltpu

_VMEM_LIMIT = 32 * 1024 * 1024


def _round_up(x, m):
    return ((x + m - 1) // m) * m


# ---------------------------------------------------------------------------
# Kernel 1: histogram of valid token ids over the codebook — single pass over ids.
#   ids:    (Np, 1) int32, masked / padded positions hold the sentinel -1
#   counts: (1, Kp) int32  — resident accumulator over the (only) N grid axis
# Grid: (Np // tn,)  ["arbitrary"];  K tiles are walked inside the kernel body.
# ---------------------------------------------------------------------------
def _hist_kernel(ids_ref, counts_ref, *, tk, n_k_tiles):
    nblk = pl.program_id(0)

    @pl.when(nblk == 0)
    def _():
        counts_ref[...] = jnp.zeros_like(counts_ref)

    ids = ids_ref[...]                                    # (tn, 1) int32
    tn = ids.shape[0]
    ones_row = jnp.ones((1, tn), jnp.bfloat16)            # hoisted out of the K loop

    def accum(lane_slice, start_val):
        codes = jax.lax.broadcasted_iota(jnp.int32, (1, tk), 1) + start_val
        onehot = (ids == codes).astype(jnp.bfloat16)      # (tn, tk) exact 0/1
        # MXU reduction over tn (instead of an XLU sublane reduce).
        partial = jax.lax.dot_general(
            ones_row, onehot, (((1,), (0,)), ((), ())),
            preferred_element_type=jnp.float32)           # (1, tk) f32, exact
        counts_ref[:, lane_slice] = counts_ref[:, lane_slice] + partial.astype(jnp.int32)

    if n_k_tiles <= 64:
        # Small codebooks: fully static slices (zero dynamic-slice overhead).
        for kt in range(n_k_tiles):
            accum(pl.ds(kt * tk, tk), kt * tk)
    else:
        def body(kt, carry):
            start = pl.multiple_of(kt * tk, tk)
            accum(pl.ds(start, tk), start)
            return carry
        jax.lax.fori_loop(0, n_k_tiles, body, 0)


def token_histogram(ids_sentinel_flat, codebook_size, tk=128, tn_max=8192):
    n = ids_sentinel_flat.shape[0]
    tn = tn_max if n >= tn_max else _round_up(max(n, 8), 8)
    np_ = _round_up(n, tn)
    kp = _round_up(codebook_size, tk)

    ids = ids_sentinel_flat.astype(jnp.int32)
    if np_ != n:
        ids = jnp.concatenate([ids, jnp.full((np_ - n,), -1, jnp.int32)])
    ids = ids.reshape(np_, 1)

    counts = pl.pallas_call(
        functools.partial(_hist_kernel, tk=tk, n_k_tiles=kp // tk),
        out_shape=jax.ShapeDtypeStruct((1, kp), jnp.int32),
        grid_spec=pltpu.PrefetchScalarGridSpec(
            num_scalar_prefetch=0,
            grid=(np_ // tn,),
            in_specs=[pl.BlockSpec((tn, 1), lambda nn: (nn, 0))],
            out_specs=pl.BlockSpec((1, kp), lambda nn: (0, 0)),
        ),
        compiler_params=pltpu.CompilerParams(
            dimension_semantics=("arbitrary",),
            vmem_limit_bytes=_VMEM_LIMIT),
    )(ids)
    return counts[0, :codebook_size]


# ---------------------------------------------------------------------------
# Kernel 2: per-row decimal-digit sums and valid-token counts.
#   ids:  (Bp, L) int32, sentinel -1 at masked / padded positions
#   dsum: (Bp, 1) f32 — sum over valid tokens of len(str(token))
#   vcnt: (Bp, 1) f32 — number of valid tokens per row
# (Assumes valid token ids are non-negative, i.e. no '-' sign in str().)
# ---------------------------------------------------------------------------
def _bits_kernel(ids_ref, dsum_ref, vcnt_ref, *, n_thresh):
    ids = ids_ref[...]
    valid = ids >= 0
    digits = jnp.ones(ids.shape, jnp.int32)
    thresh = 10
    for _ in range(n_thresh):
        digits = digits + (ids >= thresh).astype(jnp.int32)
        thresh *= 10
    digits = jnp.where(valid, digits, 0)
    dsum_ref[...] = jnp.sum(digits, axis=1, keepdims=True).astype(jnp.float32)
    vcnt_ref[...] = jnp.sum(valid.astype(jnp.int32), axis=1,
                            keepdims=True).astype(jnp.float32)


def bits_stats(ids_sentinel, codebook_size):
    b, l = ids_sentinel.shape
    bb = min(256, _round_up(b, 8))        # large batch blocks: fewer grid steps
    bp = _round_up(b, bb)
    ids = ids_sentinel.astype(jnp.int32)
    if bp != b:
        ids = jnp.concatenate([ids, jnp.full((bp - b, l), -1, jnp.int32)], axis=0)
    n_thresh = max(len(str(max(codebook_size - 1, 1))) - 1, 0)

    dsum, vcnt = pl.pallas_call(
        functools.partial(_bits_kernel, n_thresh=n_thresh),
        out_shape=(jax.ShapeDtypeStruct((bp, 1), jnp.float32),
                   jax.ShapeDtypeStruct((bp, 1), jnp.float32)),
        grid_spec=pltpu.PrefetchScalarGridSpec(
            num_scalar_prefetch=0,
            grid=(bp // bb,),
            in_specs=[pl.BlockSpec((bb, l), lambda i: (i, 0))],
            out_specs=(pl.BlockSpec((bb, 1), lambda i: (i, 0)),
                       pl.BlockSpec((bb, 1), lambda i: (i, 0))),
        ),
        compiler_params=pltpu.CompilerParams(
            dimension_semantics=("parallel",),
            vmem_limit_bytes=_VMEM_LIMIT),
    )(ids)
    return dsum[:b, 0], vcnt[:b, 0]


# ---------------------------------------------------------------------------
# Kernel 3: codebook minimum pairwise squared distance.
# Triangular (j >= i) block sweep driven by a scalar-prefetch (i, j) table;
# per-row squared norms are precomputed and passed in; Gram block in f32 on the MXU;
# the diagonal / padded-row mask is only built on blocks that need it.
# The mean pairwise distance is computed analytically in the wrapper.
# ---------------------------------------------------------------------------
def _min_dist_kernel(itab_ref, jtab_ref, ei_ref, ej_ref, ni_ref, nj_ref, min_ref,
                     *, k, tile, nt, padded):
    s = pl.program_id(0)

    @pl.when(s == 0)
    def _():
        min_ref[...] = jnp.full(min_ref.shape, jnp.inf, min_ref.dtype)

    bi = itab_ref[s]
    bj = jtab_ref[s]

    ei = ei_ref[...]                                               # (tile, D) f32
    ej = ej_ref[...]                                               # (tile, D) f32
    g = jax.lax.dot_general(ei, ej, (((1,), (1,)), ((), ())),
                            preferred_element_type=jnp.float32)    # (tile, tile) f32
    d2 = jnp.maximum(ni_ref[...] + nj_ref[...] - 2.0 * g, 0.0)     # (tile, tile)

    need_mask = bi == bj
    if padded:   # static: last block row/col contains padded codewords
        need_mask = jnp.logical_or(need_mask,
                                   jnp.logical_or(bi == nt - 1, bj == nt - 1))

    @pl.when(need_mask)
    def _():
        row_g = jax.lax.broadcasted_iota(jnp.int32, d2.shape, 0) + bi * tile
        col_g = jax.lax.broadcasted_iota(jnp.int32, d2.shape, 1) + bj * tile
        invalid = (row_g == col_g) | (row_g >= k) | (col_g >= k)
        m = jnp.min(jnp.where(invalid, jnp.inf, d2))
        min_ref[...] = jnp.minimum(min_ref[...], m)

    @pl.when(jnp.logical_not(need_mask))
    def _():
        min_ref[...] = jnp.minimum(min_ref[...], jnp.min(d2))


def codebook_min_sqdist(codebook_embedding):
    k, d = codebook_embedding.shape
    tile = 256 if k >= 256 else 128
    kp = _round_up(k, tile)
    e = codebook_embedding.astype(jnp.float32)
    if kp != k:
        e = jnp.concatenate([e, jnp.zeros((kp - k, d), jnp.float32)], axis=0)
    nt = kp // tile

    nrm = jnp.sum(e * e, axis=1)              # precomputed once, O(K*D)
    ni = nrm.reshape(kp, 1)
    nj = nrm.reshape(1, kp)

    pairs = [(i, j) for i in range(nt) for j in range(i, nt)]   # upper triangle
    itab = jnp.asarray([p[0] for p in pairs], jnp.int32)
    jtab = jnp.asarray([p[1] for p in pairs], jnp.int32)

    min_d2 = pl.pallas_call(
        functools.partial(_min_dist_kernel, k=k, tile=tile, nt=nt, padded=(kp != k)),
        out_shape=jax.ShapeDtypeStruct((1, 1), jnp.float32),
        grid_spec=pltpu.PrefetchScalarGridSpec(
            num_scalar_prefetch=2,
            grid=(len(pairs),),
            in_specs=[pl.BlockSpec((tile, d), lambda s, it, jt: (it[s], 0)),
                      pl.BlockSpec((tile, d), lambda s, it, jt: (jt[s], 0)),
                      pl.BlockSpec((tile, 1), lambda s, it, jt: (it[s], 0)),
                      pl.BlockSpec((1, tile), lambda s, it, jt: (0, jt[s]))],
            out_specs=pl.BlockSpec((1, 1), lambda s, it, jt: (0, 0)),
        ),
        compiler_params=pltpu.CompilerParams(
            dimension_semantics=("arbitrary",),
            vmem_limit_bytes=_VMEM_LIMIT),
    )(itab, jtab, e, e, ni, nj)
    return min_d2[0, 0]


def codebook_mean_sqdist(codebook_embedding):
    # Analytic: sum_{i != j} ||e_i - e_j||^2 = 2K*sum_i||e_i||^2 - 2*||sum_i e_i||^2.
    k = codebook_embedding.shape[0]
    e = codebook_embedding.astype(jnp.float32)
    sum_sq = jnp.sum(e * e)
    colsum = jnp.sum(e, axis=0)
    sum_off = 2.0 * k * sum_sq - 2.0 * jnp.sum(colsum * colsum)
    denom = jnp.float32(k * (k - 1)) if k > 1 else jnp.float32(1.0)
    return jnp.maximum(sum_off, 0.0) / denom


# ---------------------------------------------------------------------------
# Module wrapper (mirrors ZeroShotCodebookUtilityModel.forward)
# ---------------------------------------------------------------------------
class ZeroShotCodebookUtilityModelPallas:
    def __init__(self, d_model, codebook_embedding):
        self.d_model = d_model
        self.codebook_embedding = codebook_embedding  # (K, d_model)

    def forward(self, input_list, target=None):
        input_ids, input_mask = input_list            # (B, L) int32, (B, L) bool
        codebook_size = self.codebook_embedding.shape[0]

        # Sentinel layout: masked positions -> -1; kernels derive validity from ids >= 0.
        ids_sent = jnp.where(input_mask, jnp.int32(-1), input_ids.astype(jnp.int32))

        # --- get_codebook_utility(input_ids[~input_mask], codebook_embedding) ---
        counts = token_histogram(ids_sent.reshape(-1), codebook_size)     # (K,) int32
        counts_f = counts.astype(jnp.float32)
        total = jnp.maximum(jnp.sum(counts_f), 1.0)
        utilization = jnp.mean((counts > 0).astype(jnp.float32))
        probs = counts_f / total
        plogp = jnp.where(probs > 0, probs * jnp.log(jnp.maximum(probs, 1e-30)), 0.0)
        entropy = -jnp.sum(plogp)           # TODO(synk): base (nats) unverified vs reference
        perplexity = jnp.exp(entropy)

        mean_d2 = codebook_mean_sqdist(self.codebook_embedding)
        min_d2 = codebook_min_sqdist(self.codebook_embedding)

        metrics = {
            "utilization": utilization,
            "entropy": entropy,
            "perplexity": perplexity,
            "codebook_mean_pairwise_sqdist": mean_d2,
            "codebook_min_pairwise_sqdist": min_d2,
        }

        # --- compression ratio: sum(len(str(token))) / (len(tokens) * 4 * 3 * 6) per row ---
        dsum, vcnt = bits_stats(ids_sent, codebook_size)
        # Rows with zero valid tokens would divide by zero in the PyTorch reference; define 0.
        ratio = jnp.where(vcnt > 0, dsum / (jnp.maximum(vcnt, 1.0) * 72.0), 0.0)
        metrics["compression_ratio"] = jnp.mean(ratio)

        loss = jnp.zeros((1,), jnp.float32)
        # TODO(synk): data-dependent-shape boolean gather; works eagerly but cannot run
        # under jax.jit (no clean Pallas equivalent for ragged output).
        flat_tokens = input_ids[~input_mask]
        return (loss, metrics), flat_tokens, None


# ---------------------------------------------------------------------------
if __name__ == "__main__":
    B, L = 2, 16          # batch, sequence length
    K, D = 128, 32        # codebook size, d_model

    key = jax.random.PRNGKey(0)
    k_ids, k_mask, k_emb = jax.random.split(key, 3)

    input_ids = jax.random.randint(k_ids, (B, L), 0, K, dtype=jnp.int32)
    # mask out roughly 25% of positions, but never an entire row
    input_mask = jax.random.bernoulli(k_mask, 0.25, (B, L))
    input_mask = input_mask.at[:, 0].set(False)
    codebook_embedding = jax.random.normal(k_emb, (K, D), dtype=jnp.float32)

    model = ZeroShotCodebookUtilityModelPallas(d_model=D,
                                               codebook_embedding=codebook_embedding)
    (loss, metrics), flat_tokens, _ = model.forward((input_ids, input_mask))

    jax.block_until_ready(loss)
    for v in metrics.values():
        jax.block_until_ready(v)
    jax.block_until_ready(flat_tokens)

    print("KERNEL_OK")
</pallas_src>

<mosaic_0001>
module attributes {stable_mosaic.version = 11 : i64} {
  func.func @_hist_kernel(%arg0: i32, %arg1: memref<32x1xi32, #tpu.memory_space<vmem>>, %arg2: memref<1x128xi32, #tpu.memory_space<vmem>>) attributes {dimension_semantics = [#tpu.dimension_semantics<arbitrary>], iteration_bounds = array<i64: 1>, scalar_prefetch = 0 : i64, scratch_operands = 0 : i64, tpu.core_type = #tpu.core_type<tc>, window_params = [{transform_indices = @transform_0, window_bounds = array<i64: 32, 1>}, {pipeline_mode = #tpu.pipeline_mode<synchronous>, transform_indices = @transform_1, window_bounds = array<i64: 1, 128>}]} {
    %c0_i32 = arith.constant 0 : i32
    %0 = arith.cmpi eq, %arg0, %c0_i32 : i32
    %1 = arith.extui %0 : i1 to i32
    %c0_i32_0 = arith.constant 0 : i32
    %2 = arith.cmpi ne, %1, %c0_i32_0 : i32
    scf.if %2 {
      %c0_i32_8 = arith.constant 0 : i32
      %19 = vector.broadcast %c0_i32_8 : i32 to vector<1x128xi32>
      %c0_9 = arith.constant 0 : index
      %c0_10 = arith.constant 0 : index
      %20 = vector.load %arg2[%c0_9, %c0_10] : memref<1x128xi32, #tpu.memory_space<vmem>>, vector<1x128xi32>
      tpu.vector_store %arg2[%c0_9, %c0_10], %19 {strides = array<i32>} : memref<1x128xi32, #tpu.memory_space<vmem>>, vector<1x128xi32>,
    } else {
    }
    %c0 = arith.constant 0 : index
    %c0_1 = arith.constant 0 : index
    %3 = vector.load %arg1[%c0, %c0_1] : memref<32x1xi32, #tpu.memory_space<vmem>>, vector<32x1xi32>
    %cst = arith.constant 1.000000e+00 : bf16
    %4 = vector.broadcast %cst : bf16 to vector<1x32xbf16>
    %5 = tpu.iota {dimensions = array<i32: 1>} : vector<1x128xi32>
    %c0_i32_2 = arith.constant 0 : i32
    %6 = vector.broadcast %c0_i32_2 : i32 to vector<1x128xi32>
    %7 = arith.addi %5, %6 : vector<1x128xi32>
    %8 = vector.broadcast %3 : vector<32x1xi32> to vector<32x128xi32>
    %9 = vector.broadcast %7 : vector<1x128xi32> to vector<32x128xi32>
    %10 = arith.cmpi eq, %8, %9 : vector<32x128xi32>
    %11 = arith.extui %10 : vector<32x128xi1> to vector<32x128xi32>
    %12 = arith.sitofp %11 : vector<32x128xi32> to vector<32x128xf32>
    %13 = arith.truncf %12 : vector<32x128xf32> to vector<32x128xbf16>
    %cst_3 = arith.constant dense<0.000000e+00> : vector<1x128xf32>
    %14 = tpu.matmul %4, %13, %cst_3 {dimension_numbers = #tpu.dot_dimension_numbers<[1], [0], [0], [1], [0, 0, 1, 1], [], []>} : vector<1x32xbf16>, vector<32x128xbf16>, vector<1x128xf32> -> vector<1x128xf32>
    %c0_4 = arith.constant 0 : index
    %c0_5 = arith.constant 0 : index
    %15 = vector.load %arg2[%c0_4, %c0_5] : memref<1x128xi32, #tpu.memory_space<vmem>>, vector<1x128xi32>
    %16 = arith.fptosi %14 : vector<1x128xf32> to vector<1x128xi32>
    %17 = arith.addi %15, %16 : vector<1x128xi32>
    %c0_6 = arith.constant 0 : index
    %c0_7 = arith.constant 0 : index
    %18 = vector.load %arg2[%c0_6, %c0_7] : memref<1x128xi32, #tpu.memory_space<vmem>>, vector<1x128xi32>
    tpu.vector_store %arg2[%c0_6, %c0_7], %17 {strides = array<i32>} : memref<1x128xi32, #tpu.memory_space<vmem>>, vector<1x128xi32>,
    return
  }
  func.func @transform_0(%arg0: i32) -> (i32, i32) {
    %c0_i32 = arith.constant 0 : i32
    %c0_i32_0 = arith.constant 0 : i32
    return %arg0, %c0_i32 : i32, i32
  }
  func.func @transform_1(%arg0: i32) -> (i32, i32) {
    %c0_i32 = arith.constant 0 : i32
    %c0_i32_0 = arith.constant 0 : i32
    %c0_i32_1 = arith.constant 0 : i32
    return %c0_i32, %c0_i32_0 : i32, i32
  }
}

</mosaic_0001>

<bundles_post_ra>
// kernel: tpu_custom_call.1
= control target key start
LH: loop header
LB: loop body
LE: loop exit
PB: predicated region body
PF: predicated region fallthrough
CT: control target
= control target key end

     0   :  { %v162_v2 = vmov 0   ;;  %s193_s0 = inlined_call_operand.vmem [shape: s32[32,1], index: 0, kind: input, shape index: {}]   ;;  %s194_s1 = inlined_call_operand.hbm [shape: s32[1,128], index: 1, kind: output, shape index: {}]  }
   0x1   :  { %v16_v0 = vld [vmem:[%s193_s0] sm:$0xff]  ;;  %v18_v1 = vld [vmem:[%s193_s0 + $0x10] sm:$0xff]  ;;  %139 = vset.pattern.permute.xlu1 %v162_v2  ;;  %15 = vst [vmem:[#allocation2] sm:$0x1] %v162_v2  ;;  %138 = vset.pattern.permute.xlu0 %v162_v2 }
   0x2   :  { %6 = vsyncpa [#allocation3], 0  ;;  %23 = vperm.xlu1 %139, %v16_v0   ;;  %29 = vperm.xlu0 %138, %v18_v1   ;;  %v17_v3 = vld [vmem:[%s193_s0 + $0x8] sm:$0xff]  ;;  %v19_v4 = vld [vmem:[%s193_s0 + $0x18] sm:$0xff]  ;;  %v163_v5 = vmov 0.0   ;;  %vm164_vm0 = vmmov 0   ;;  %v20_v6 = vlaneseq }
   0x3   :  { %122 = vmatprep.subr.bf16.mxu0 %v163_v5  ;;  %126 = vmatprep.mubr.msk.bf16.mxu0 %vm164_vm0, %v163_v5  ;;  %v165_v12 = vmov 1.0|1.0   ;;  %vm48_vm7 = vcmask 261120   ;;  %v166_v13 = vmov 1065369472   ;;  %s167_s0 = smov [#allocation2]  }
   0x4   :  { %v21_v9 = vand.u32 127, %v20_v6  ;;  %s102_s14 = sshll.u32 %s167_s0, 4  ;;  %s103_s14 = int_to_ptr.vmem [resolvable:$true] %s102_s14 }
   0x5   :  { %s140_s15 = scalar_lea.vmem %s103_s14, 16  ;;  %s144_s16 = scalar_lea.vmem %s103_s14, 32 }
   0x6   :  { %26 = vperm.xlu1 %139, %v17_v3   ;;  %32 = vperm.xlu0 %138, %v19_v4   ;;  %p141_p0 = scmp.ne.s32.totalorder %s103_s14, %s140_s15  ;;  %p145_p1 = scmp.lt.s32.totalorder %s103_s14, %s103_s14 }
   0x7   :  { %p146_p2 = scmp.lt.s32.totalorder %s144_s16, %s140_s15 }
   0x8   :  { %v92_v16 = vld [vmem:[#allocation2] sm:$0x1] }
   0x9   :  { %p147_p3 = por %p146_p2, %p145_p1 }
   0xb   :  { %p148_p4 = pnand %p147_p3, %p141_p0 }
  0x7d   :  { %v24_v7 = vpop.permute.xlu1 %23  ;;  %v30_v8 = vpop.permute.xlu0 %29 }
  0x7e   :  { %vm36_vm2 = vcmp.eq.s32.totalorder %v30_v8, %v21_v9  ;;  %vm34_vm4 = vcmp.eq.s32.totalorder %v24_v7, %v21_v9 }
  0x81   :  { %v33_v10 = vpop.permute.xlu0 %32  ;;  %v27_v11 = vpop.permute.xlu1 %26 }
  0x82   :  { %vm37_vm1 = vcmp.eq.s32.totalorder %v33_v10, %v21_v9  ;;  %vm35_vm5 = vcmp.eq.s32.totalorder %v27_v11, %v21_v9 }
  0x83   :  { %vm114_vm3 = vmpackc.low %vm37_vm1, %vm36_vm2 }
  0x84   :  { %123 = vmatpush3.bf16.msk.msra.mxu0 %vm114_vm3, %v165_v12  ;;  %vm116_vm6 = vmpackc.low %vm35_vm5, %vm34_vm4 }
  0x85   :  { %124 = vmatprep.subr.bf16.mxu0 %v163_v5 }
  0x88   :  { %125 = vmatpush3.bf16.msk.msra.mxu0 %vm116_vm6, %v165_v12 }
  0x8b   :  { %127 = vmatmul.mubr.msk.bf16.vlgmr.msra.gmra.mxu0 %vm48_vm7, %v166_v13 }
 0x14b   :  { %v86_v14 = vpop.f32.mrf.mxu0 }
 0x14c   :  { %v130_v15 = vtrunc.f32 %v86_v14 }
 0x14d   :  { %v128_v17 = vpop.f32.mrf.mxu0 }
 0x14e   :  { %v131_v18 = vcvt.f32.s32 %v130_v15 }
 0x14f   :  { %v89_v19 = vpop.f32.mrf.mxu0 }
 0x150   :  { %v94_v20 = vadd.s32 %v131_v18, %v92_v16 }
 0x151   :  { %v129_v21 = vpop.f32.mrf.mxu0 }
 0x152   :  { %95 = vst [vmem:[#allocation2] sm:$0x1] %v94_v20 }
 0x153   :  { %151 = shalt.err (!%p148_p4)
}
 0x154   :  { %105 = dma.vmem_to_hbm [thread:$0]  %s103_s14, 16, %s194_s1, [#allocation3]  }
 0x155   :  { %160 = dma.done.wait [#allocation3], 16  }
 0x156   :  { %161 = vsyncadd [#allocation3], 4294967280 }
 0x157   :  { %109 = vsyncpa [#allocation3], 1 }

</bundles_post_ra>
